<compile_context>
chip_gen: v5e
topology: v5e:2x2
jax: 0.10.0
libtpu: 0.0.40
codegen_flags: <defaults>
</compile_context>

<pallas_src>
import functools

import jax
import jax.numpy as jnp
from jax.experimental import pallas as pl
from jax.experimental.pallas import tpu as pltpu

_LANE = 128


def _round_up(x, m):
    return ((x + m - 1) // m) * m


def _sublane(itemsize):
    return {4: 8, 2: 16, 1: 32}.get(itemsize, 8)


def _tpu_caps():
    """(vmem_limit_bytes, working_budget_bytes, num_tensorcores) for this chip."""
    phys = 128 * 1024 * 1024
    num_tc = 1
    try:
        info = pltpu.get_tpu_info()
        phys = int(getattr(info, "vmem_capacity_bytes", phys))
        for attr in ("num_cores", "tensor_cores_per_chip", "cores_per_chip"):
            v = getattr(info, attr, None)
            if v:
                num_tc = int(v)
                break
        else:
            if phys <= 64 * 1024 * 1024:   # v7x: 64 MiB per TC, 2 TCs per chip
                num_tc = 2
    except Exception:
        pass
    if phys <= 64 * 1024 * 1024:           # v7x
        limit, budget = 46 * 1024 * 1024, 38 * 1024 * 1024
    else:                                   # v5e / v6e (128 MiB physical)
        limit, budget = 100 * 1024 * 1024, 88 * 1024 * 1024
    return min(limit, phys), min(budget, phys), num_tc


def _pick_tm(M, D, H, itemsize, budget_bytes, num_tc):
    """Largest sublane-aligned row tile within the VMEM budget, with a grid
    balanced across TensorCores and (when possible) dividing M exactly."""
    sub = _sublane(itemsize)
    w_bytes = (D * H + H * D) * itemsize        # W1 + W2, single-buffered
    p_bytes = (H + 3 * D) * itemsize + 4 * D    # b1, b2, gamma, beta + f32 mask
    per_row = 2 * (2 * D) * itemsize            # streamed x + out, double-buffered
    per_row += H * 4 + 4 * D * 4                # f32 hidden + f32 working values
    avail = max(budget_bytes - w_bytes - p_bytes, sub * per_row)
    tm_max = int(min(avail // per_row, 1024))
    tm_max = max(sub, (tm_max // sub) * sub)

    Msub = _round_up(M, sub)
    n_sub_rows = Msub // sub

    # Single TC (v5e/v6e), or too few rows to split: one tile if it fits —
    # extra grid steps only add overhead and shrink the MXU LHS fill.
    if Msub <= tm_max and (num_tc <= 1 or n_sub_rows < num_tc):
        return Msub

    min_tiles = pl.cdiv(Msub, tm_max)
    tiles = max(min_tiles, num_tc)
    if num_tc > 1:
        tiles = _round_up(tiles, num_tc)          # balanced megacore sharding
        if n_sub_rows >= 2 * num_tc and tiles < 2 * num_tc:
            tiles = 2 * num_tc                    # >= 2 steps/core: DMA overlap
    tiles = max(1, min(tiles, n_sub_rows))

    # Prefer a tile count that divides the (sublane-rounded) row count exactly
    # so the wrapper never pads/copies the activations, keeping cores balanced.
    for t in range(tiles, min(n_sub_rows, tiles + 128) + 1):
        if n_sub_rows % t:
            continue
        if num_tc > 1 and t > 1 and t % num_tc:
            continue
        cand = (n_sub_rows // t) * sub
        if cand <= tm_max:
            return cand

    # Fall back to cdiv + tail padding in the wrapper.
    tm = _round_up(pl.cdiv(Msub, tiles), sub)
    return max(sub, min(tm, tm_max))


def _ffn_kernel(x_ref, w1_ref, b1_ref, w2_ref, b2_ref, g_ref, beta_ref,
                mask_ref, o_ref, *, eps, d_valid):
    # x tile: (tm, D) in the model dtype — fed straight to the MXU.
    x = x_ref[...]

    # w_1 + ReLU (MXU matmul, f32 accumulation).
    h = jnp.dot(x, w1_ref[...], preferred_element_type=jnp.float32)
    h = jnp.maximum(h + b1_ref[...].astype(jnp.float32), 0.0)

    # w_2 (hidden cast back to the weight dtype so bf16 weights keep the
    # bf16-native MXU path), then bias + residual, widened to f32 exactly once.
    y = jnp.dot(h.astype(w2_ref.dtype), w2_ref[...],
                preferred_element_type=jnp.float32)
    y = y + b2_ref[...].astype(jnp.float32) + x.astype(jnp.float32)

    # LayerNorm over the true feature count d_valid.  Padded lanes of y are
    # exactly zero; when features are lane-padded, the centered values are
    # masked with a resident (1, D) 0/1 mask (broadcast multiply, no iota).
    inv_d = 1.0 / d_valid
    mean = jnp.sum(y, axis=-1, keepdims=True) * inv_d
    centered = y - mean
    sq = centered if d_valid == y.shape[-1] else centered * mask_ref[...]
    var = jnp.sum(sq * sq, axis=-1, keepdims=True) * inv_d
    out = centered * jax.lax.rsqrt(var + eps)
    out = out * g_ref[...].astype(jnp.float32) + beta_ref[...].astype(jnp.float32)

    o_ref[...] = out.astype(o_ref.dtype)


def prepare_ffn_params(w1, b1, w2, b2, gamma, beta):
    """Pad FFN parameters to lane-dense (multiple-of-128) feature dims.

    Call once at model-init time, not per forward, so the padded weight copies
    do not add HBM traffic on every call.  w1: (d_in, d_hid), w2: (d_hid, d_in)
    in nn.Linear's pre-transposed (in_features, out_features) layout.
    """
    d_in, d_hid = w1.shape
    D = _round_up(d_in, _LANE)
    H = _round_up(d_hid, _LANE)
    w1p = w1 if (D, H) == (d_in, d_hid) else jnp.pad(w1, ((0, D - d_in), (0, H - d_hid)))
    w2p = w2 if (D, H) == (d_in, d_hid) else jnp.pad(w2, ((0, H - d_hid), (0, D - d_in)))
    b1p = jnp.pad(b1, (0, H - d_hid)).reshape(1, H)
    b2p = jnp.pad(b2, (0, D - d_in)).reshape(1, D)
    g2d = jnp.pad(gamma, (0, D - d_in)).reshape(1, D)
    bt2d = jnp.pad(beta, (0, D - d_in)).reshape(1, D)
    mask = (jnp.arange(D) < d_in).astype(jnp.float32).reshape(1, D)
    return dict(w1=w1p, b1=b1p, w2=w2p, b2=b2p, gamma=g2d, beta=bt2d,
                mask=mask, d_in=d_in, d_hid=d_hid)


def positionwise_feed_forward(x, params, *, eps=1e-6, tm=None):
    """x: (B, S, d_in); params from prepare_ffn_params()."""
    B, S, d_in = x.shape
    assert d_in == params["d_in"], "x feature dim does not match prepared params"
    D, H = params["w1"].shape
    M = B * S
    itemsize = jnp.dtype(x.dtype).itemsize
    sub = _sublane(itemsize)

    vmem_limit, vmem_budget, num_tc = _tpu_caps()
    if tm is None:
        tm = _pick_tm(M, D, H, itemsize, vmem_budget, num_tc)
    tm = max(sub, (int(tm) // sub) * sub)
    grid_m = pl.cdiv(M, tm)
    Mp = grid_m * tm

    x2d = x.reshape(M, d_in)
    if Mp != M or D != d_in:
        # Zero-padded rows/lanes stay exactly zero through both matmuls and are
        # masked out of the LayerNorm statistics; sliced off below.
        x2d = jnp.pad(x2d, ((0, Mp - M), (0, D - d_in)))

    flops = 4 * Mp * D * H                         # two matmuls
    bytes_accessed = (2 * Mp * D + 2 * D * H + 2 * H + 6 * D) * itemsize

    def resident(shape):
        return pl.BlockSpec(shape, lambda i: (0, 0),
                            pipeline_mode=pl.Buffered(1))

    out2d = pl.pallas_call(
        functools.partial(_ffn_kernel, eps=eps, d_valid=d_in),
        out_shape=jax.ShapeDtypeStruct((Mp, D), x.dtype),
        grid_spec=pltpu.PrefetchScalarGridSpec(
            num_scalar_prefetch=0,
            grid=(grid_m,),
            in_specs=[
                pl.BlockSpec((tm, D), lambda i: (i, 0)),   # x row tile (streamed)
                resident((D, H)),                          # W1 (resident)
                resident((1, H)),                          # b1
                resident((H, D)),                          # W2 (resident)
                resident((1, D)),                          # b2
                resident((1, D)),                          # gamma
                resident((1, D)),                          # beta
                resident((1, D)),                          # feature mask
            ],
            out_specs=pl.BlockSpec((tm, D), lambda i: (i, 0)),
        ),
        compiler_params=pltpu.CompilerParams(
            dimension_semantics=("parallel",),
            vmem_limit_bytes=vmem_limit),
        cost_estimate=pl.CostEstimate(flops=flops, transcendentals=Mp,
                                      bytes_accessed=bytes_accessed),
    )(x2d, params["w1"], params["b1"], params["w2"], params["b2"],
      params["gamma"], params["beta"], params["mask"])

    if Mp != M or D != d_in:
        out2d = out2d[:M, :d_in]
    return out2d.reshape(B, S, d_in)


def _reference(x, w1, b1, w2, b2, gamma, beta, eps=1e-6):
    residual = x
    h = jnp.maximum(x @ w1 + b1, 0.0)
    y = h @ w2 + b2 + residual
    mean = jnp.mean(y, axis=-1, keepdims=True)
    var = jnp.mean((y - mean) ** 2, axis=-1, keepdims=True)
    return (y - mean) / jnp.sqrt(var + eps) * gamma + beta


def _make_inputs(key, B, S, d_in, d_hid, dtype=jnp.float32):
    kx, k1, kb1, k2, kb2 = jax.random.split(key, 5)
    x = jax.random.normal(kx, (B, S, d_in), dtype=dtype)
    # nn.Linear weights stored pre-transposed: (in_features, out_features).
    w1 = jax.random.normal(k1, (d_in, d_hid), dtype=dtype) * (1.0 / d_in) ** 0.5
    b1 = jax.random.normal(kb1, (d_hid,), dtype=dtype) * 0.01
    w2 = jax.random.normal(k2, (d_hid, d_in), dtype=dtype) * (1.0 / d_hid) ** 0.5
    b2 = jax.random.normal(kb2, (d_in,), dtype=dtype) * 0.01
    gamma = jnp.ones((d_in,), dtype=dtype)   # LayerNorm default init
    beta = jnp.zeros((d_in,), dtype=dtype)
    return x, w1, b1, w2, b2, gamma, beta


if __name__ == "__main__":
    key = jax.random.PRNGKey(0)
    k0, k1 = jax.random.split(key)

    # Case 1: nominal small shape (B=2, S=8, d_in=32, d_hid=64).
    x, w1, b1, w2, b2, gamma, beta = _make_inputs(k0, 2, 8, 32, 64)
    params = prepare_ffn_params(w1, b1, w2, b2, gamma, beta)   # once, at "init"
    out = jax.block_until_ready(positionwise_feed_forward(x, params))
    ref = _reference(x, w1, b1, w2, b2, gamma, beta)
    assert out.shape == x.shape
    assert jnp.allclose(out, ref, atol=1e-4, rtol=1e-4), "mismatch vs reference (case 1)"

    # Case 2: ragged row count + non-128 features exercises the cdiv grid,
    # tail-row padding, lane-padding and the masked-variance path.
    x2, *p2 = _make_inputs(k1, 3, 5, 48, 96)
    params2 = prepare_ffn_params(*p2)
    out2 = jax.block_until_ready(positionwise_feed_forward(x2, params2))
    ref2 = _reference(x2, *p2)
    assert out2.shape == x2.shape
    assert jnp.allclose(out2, ref2, atol=1e-4, rtol=1e-4), "mismatch vs reference (case 2)"

    print("KERNEL_OK")
</pallas_src>

<mosaic_0001>
module attributes {stable_mosaic.version = 11 : i64} {
  func.func @_ffn_kernel(%arg0: i32, %arg1: memref<16x128xf32, #tpu.memory_space<vmem>>, %arg2: memref<128x128xf32, #tpu.memory_space<vmem>>, %arg3: memref<1x128xf32, #tpu.memory_space<vmem>>, %arg4: memref<128x128xf32, #tpu.memory_space<vmem>>, %arg5: memref<1x128xf32, #tpu.memory_space<vmem>>, %arg6: memref<1x128xf32, #tpu.memory_space<vmem>>, %arg7: memref<1x128xf32, #tpu.memory_space<vmem>>, %arg8: memref<1x128xf32, #tpu.memory_space<vmem>>, %arg9: memref<16x128xf32, #tpu.memory_space<vmem>>) attributes {dimension_semantics = [#tpu.dimension_semantics<parallel>], iteration_bounds = array<i64: 1>, scalar_prefetch = 0 : i64, scratch_operands = 0 : i64, tpu.core_type = #tpu.core_type<tc>, window_params = [{transform_indices = @transform_0, window_bounds = array<i64: 16, 128>}, {pipeline_mode = #tpu.pipeline_mode<synchronous>, transform_indices = @transform_1, window_bounds = array<i64: 128, 128>}, {pipeline_mode = #tpu.pipeline_mode<synchronous>, transform_indices = @transform_2, window_bounds = array<i64: 1, 128>}, {pipeline_mode = #tpu.pipeline_mode<synchronous>, transform_indices = @transform_3, window_bounds = array<i64: 128, 128>}, {pipeline_mode = #tpu.pipeline_mode<synchronous>, transform_indices = @transform_4, window_bounds = array<i64: 1, 128>}, {pipeline_mode = #tpu.pipeline_mode<synchronous>, transform_indices = @transform_5, window_bounds = array<i64: 1, 128>}, {pipeline_mode = #tpu.pipeline_mode<synchronous>, transform_indices = @transform_6, window_bounds = array<i64: 1, 128>}, {pipeline_mode = #tpu.pipeline_mode<synchronous>, transform_indices = @transform_7, window_bounds = array<i64: 1, 128>}, {transform_indices = @transform_8, window_bounds = array<i64: 16, 128>}]} {
    %c0 = arith.constant 0 : index
    %c0_0 = arith.constant 0 : index
    %0 = vector.load %arg1[%c0, %c0_0] : memref<16x128xf32, #tpu.memory_space<vmem>>, vector<16x128xf32>
    %c0_1 = arith.constant 0 : index
    %c0_2 = arith.constant 0 : index
    %1 = vector.load %arg2[%c0_1, %c0_2] : memref<128x128xf32, #tpu.memory_space<vmem>>, vector<128x128xf32>
    %cst = arith.constant dense<0.000000e+00> : vector<16x128xf32>
    %2 = tpu.matmul %0, %1, %cst {dimension_numbers = #tpu.dot_dimension_numbers<[1], [0], [0], [1], [0, 0, 1, 1], [], []>} : vector<16x128xf32>, vector<128x128xf32>, vector<16x128xf32> -> vector<16x128xf32>
    %c0_3 = arith.constant 0 : index
    %c0_4 = arith.constant 0 : index
    %3 = vector.load %arg3[%c0_3, %c0_4] : memref<1x128xf32, #tpu.memory_space<vmem>>, vector<1x128xf32>
    %4 = vector.broadcast %3 : vector<1x128xf32> to vector<16x128xf32>
    %5 = arith.addf %2, %4 : vector<16x128xf32>
    %cst_5 = arith.constant 0.000000e+00 : f32
    %6 = vector.broadcast %cst_5 : f32 to vector<16x128xf32>
    %7 = arith.maximumf %5, %6 : vector<16x128xf32>
    %c0_6 = arith.constant 0 : index
    %c0_7 = arith.constant 0 : index
    %8 = vector.load %arg4[%c0_6, %c0_7] : memref<128x128xf32, #tpu.memory_space<vmem>>, vector<128x128xf32>
    %cst_8 = arith.constant dense<0.000000e+00> : vector<16x128xf32>
    %9 = tpu.matmul %7, %8, %cst_8 {dimension_numbers = #tpu.dot_dimension_numbers<[1], [0], [0], [1], [0, 0, 1, 1], [], []>} : vector<16x128xf32>, vector<128x128xf32>, vector<16x128xf32> -> vector<16x128xf32>
    %c0_9 = arith.constant 0 : index
    %c0_10 = arith.constant 0 : index
    %10 = vector.load %arg5[%c0_9, %c0_10] : memref<1x128xf32, #tpu.memory_space<vmem>>, vector<1x128xf32>
    %11 = vector.broadcast %10 : vector<1x128xf32> to vector<16x128xf32>
    %12 = arith.addf %9, %11 : vector<16x128xf32>
    %13 = arith.addf %12, %0 : vector<16x128xf32>
    %cst_11 = arith.constant dense<0.000000e+00> : vector<16xf32>
    %14 = vector.multi_reduction <add>, %13, %cst_11 [1] : vector<16x128xf32> to vector<16xf32>
    %15 = vector.shape_cast %14 : vector<16xf32> to vector<16x1xf32>
    %cst_12 = arith.constant 3.125000e-02 : f32
    %16 = vector.broadcast %cst_12 : f32 to vector<16x1xf32>
    %17 = arith.mulf %15, %16 : vector<16x1xf32>
    %18 = vector.broadcast %17 : vector<16x1xf32> to vector<16x128xf32>
    %19 = arith.subf %13, %18 : vector<16x128xf32>
    %c0_13 = arith.constant 0 : index
    %c0_14 = arith.constant 0 : index
    %20 = vector.load %arg8[%c0_13, %c0_14] : memref<1x128xf32, #tpu.memory_space<vmem>>, vector<1x128xf32>
    %21 = vector.broadcast %20 : vector<1x128xf32> to vector<16x128xf32>
    %22 = arith.mulf %19, %21 : vector<16x128xf32>
    %23 = arith.mulf %22, %22 : vector<16x128xf32>
    %cst_15 = arith.constant dense<0.000000e+00> : vector<16xf32>
    %24 = vector.multi_reduction <add>, %23, %cst_15 [1] : vector<16x128xf32> to vector<16xf32>
    %25 = vector.shape_cast %24 : vector<16xf32> to vector<16x1xf32>
    %cst_16 = arith.constant 3.125000e-02 : f32
    %26 = vector.broadcast %cst_16 : f32 to vector<16x1xf32>
    %27 = arith.mulf %25, %26 : vector<16x1xf32>
    %cst_17 = arith.constant 9.99999997E-7 : f32
    %28 = vector.broadcast %cst_17 : f32 to vector<16x1xf32>
    %29 = arith.addf %27, %28 : vector<16x1xf32>
    %30 = math.rsqrt %29 : vector<16x1xf32>
    %31 = vector.broadcast %30 : vector<16x1xf32> to vector<16x128xf32>
    %32 = arith.mulf %19, %31 : vector<16x128xf32>
    %c0_18 = arith.constant 0 : index
    %c0_19 = arith.constant 0 : index
    %33 = vector.load %arg6[%c0_18, %c0_19] : memref<1x128xf32, #tpu.memory_space<vmem>>, vector<1x128xf32>
    %34 = vector.broadcast %33 : vector<1x128xf32> to vector<16x128xf32>
    %35 = arith.mulf %32, %34 : vector<16x128xf32>
    %c0_20 = arith.constant 0 : index
    %c0_21 = arith.constant 0 : index
    %36 = vector.load %arg7[%c0_20, %c0_21] : memref<1x128xf32, #tpu.memory_space<vmem>>, vector<1x128xf32>
    %37 = vector.broadcast %36 : vector<1x128xf32> to vector<16x128xf32>
    %38 = arith.addf %35, %37 : vector<16x128xf32>
    %c0_22 = arith.constant 0 : index
    %c0_23 = arith.constant 0 : index
    %39 = vector.load %arg9[%c0_22, %c0_23] : memref<16x128xf32, #tpu.memory_space<vmem>>, vector<16x128xf32>
    tpu.vector_store %arg9[%c0_22, %c0_23], %38 {strides = array<i32>} : memref<16x128xf32, #tpu.memory_space<vmem>>, vector<16x128xf32>,
    return
  }
  func.func @transform_0(%arg0: i32) -> (i32, i32) {
    %c0_i32 = arith.constant 0 : i32
    %c0_i32_0 = arith.constant 0 : i32
    return %arg0, %c0_i32 : i32, i32
  }
  func.func @transform_1(%arg0: i32) -> (i32, i32) {
    %c0_i32 = arith.constant 0 : i32
    %c0_i32_0 = arith.constant 0 : i32
    %c0_i32_1 = arith.constant 0 : i32
    return %c0_i32, %c0_i32_0 : i32, i32
  }
  func.func @transform_2(%arg0: i32) -> (i32, i32) {
    %c0_i32 = arith.constant 0 : i32
    %c0_i32_0 = arith.constant 0 : i32
    %c0_i32_1 = arith.constant 0 : i32
    return %c0_i32, %c0_i32_0 : i32, i32
  }
  func.func @transform_3(%arg0: i32) -> (i32, i32) {
    %c0_i32 = arith.constant 0 : i32
    %c0_i32_0 = arith.constant 0 : i32
    %c0_i32_1 = arith.constant 0 : i32
    return %c0_i32, %c0_i32_0 : i32, i32
  }
  func.func @transform_4(%arg0: i32) -> (i32, i32) {
    %c0_i32 = arith.constant 0 : i32
    %c0_i32_0 = arith.constant 0 : i32
    %c0_i32_1 = arith.constant 0 : i32
    return %c0_i32, %c0_i32_0 : i32, i32
  }
  func.func @transform_5(%arg0: i32) -> (i32, i32) {
    %c0_i32 = arith.constant 0 : i32
    %c0_i32_0 = arith.constant 0 : i32
    %c0_i32_1 = arith.constant 0 : i32
    return %c0_i32, %c0_i32_0 : i32, i32
  }
  func.func @transform_6(%arg0: i32) -> (i32, i32) {
    %c0_i32 = arith.constant 0 : i32
    %c0_i32_0 = arith.constant 0 : i32
    %c0_i32_1 = arith.constant 0 : i32
    return %c0_i32, %c0_i32_0 : i32, i32
  }
  func.func @transform_7(%arg0: i32) -> (i32, i32) {
    %c0_i32 = arith.constant 0 : i32
    %c0_i32_0 = arith.constant 0 : i32
    %c0_i32_1 = arith.constant 0 : i32
    return %c0_i32, %c0_i32_0 : i32, i32
  }
  func.func @transform_8(%arg0: i32) -> (i32, i32) {
    %c0_i32 = arith.constant 0 : i32
    %c0_i32_0 = arith.constant 0 : i32
    return %arg0, %c0_i32 : i32, i32
  }
}

</mosaic_0001>

<bundles_post_ra>
// kernel: tpu_custom_call.1
= control target key start
LH: loop header
LB: loop body
LE: loop exit
PB: predicated region body
PF: predicated region fallthrough
CT: control target
= control target key end

     0   :  { %13 = vsyncpa [#allocation3], 0  ;;  %s488_s0 = inlined_call_operand.hbm [shape: f32[16,128], index: 0, kind: input, shape index: {}]   ;;  %s489_s1 = inlined_call_operand.hbm [shape: f32[128,128], index: 1, kind: input, shape index: {}]   ;;  %s490_s2 = inlined_call_operand.vmem [shape: f32[1,128], index: 2, kind: input, shape index: {}]   ;;  %s491_s3 = inlined_call_operand.hbm [shape: f32[128,128], index: 3, kind: input, shape index: {}]   ;;  %s492_s4 = inlined_call_operand.vmem [shape: f32[1,128], index: 4, kind: input, shape index: {}]   ;;  %s493_s5 = inlined_call_operand.vmem [shape: f32[1,128], index: 5, kind: input, shape index: {}]   ;;  %s494_s6 = inlined_call_operand.vmem [shape: f32[1,128], index: 6, kind: input, shape index: {}]   ;;  %s495_s7 = inlined_call_operand.vmem [shape: f32[1,128], index: 7, kind: input, shape index: {}]   ;;  %s496_s8 = inlined_call_operand.hbm [shape: f32[16,128], index: 8, kind: output, shape index: {}]  }
   0x1   :  { %14 = vsyncpa [#allocation6], 0 }
   0x2   :  { %15 = vsyncpa [#allocation4], 0  ;;  %s33_s29 = sshll.u32 %s489_s1, 4  ;;  %s398_s30 = smov [#allocation5]   ;;  %s34_s29 = int_to_ptr.hbm [resolvable:$true] %s33_s29 }
   0x3   :  { %s35_s9 = sshll.u32 %s398_s30, 4  ;;  %s20_s12 = sshll.u32 %s488_s0, 4  ;;  %s36_s9 = int_to_ptr.vmem [resolvable:$true] %s35_s9  ;;  %s21_s12 = int_to_ptr.hbm [resolvable:$true] %s20_s12 }
   0x4   :  { %s399_s13 = smov 128   ;;  %s400_s14 = smov 8  }
   0x5   :  { %41 = dma.hbm_to_vmem [thread:$0]  %s34_s29, 2048, %s36_s9, [#allocation6], %s399_s13, %s399_s13, %s400_s14  }
   0x6   :  { %s401_s15 = smov [#allocation2]   ;;  %s48_s1 = sshll.u32 %s491_s3, 4  ;;  %s49_s1 = int_to_ptr.hbm [resolvable:$true] %s48_s1 }
   0x7   :  { %s22_s16 = sshll.u32 %s401_s15, 4  ;;  %s402_s0 = smov [#allocation7]   ;;  %s23_s16 = int_to_ptr.vmem [resolvable:$true] %s22_s16 }
   0x8   :  { %28 = dma.hbm_to_vmem [thread:$0]  %s21_s12, 256, %s23_s16, [#allocation3], %s399_s13, %s399_s13, %s400_s14  }
   0x9   :  { %s50_s19 = sshll.u32 %s402_s0, 4  ;;  %s51_s19 = int_to_ptr.vmem [resolvable:$true] %s50_s19 }
   0xa   :  { %56 = dma.hbm_to_vmem [thread:$0]  %s49_s1, 2048, %s51_s19, [#allocation6], %s399_s13, %s399_s13, %s400_s14  }
   0xb   :  { %392 = dma.done.wait [#allocation3], 256  }
   0xc   :  { %393 = vsyncadd [#allocation3], 4294967040 }
   0xd   :  { %394 = dma.done.wait [#allocation6], 4096  }
   0xe   :  { %395 = vsyncadd [#allocation6], 4294963200  ;;  %v94_v0 = vld [vmem:[#allocation5 + $0x78] sm:$0xff]  ;;  %v93_v1 = vld [vmem:[#allocation5 + $0x70] sm:$0xff]  ;;  %s235_s29 = sshll.u32 %s496_s8, 4  ;;  %s236_s29 = int_to_ptr.hbm [resolvable:$true] %s235_s29 }
   0xf   :  { %99 = vmatpush.msra.mxu0 %v94_v0  ;;  %249 = vmatpush.msra.mxu2 %v94_v0  ;;  %v92_v2 = vld [vmem:[#allocation5 + $0x68] sm:$0xff]  ;;  %v91_v3 = vld [vmem:[#allocation5 + $0x60] sm:$0xff]  ;;  %v90_v4 = vld [vmem:[#allocation5 + $0x58] sm:$0xff] }
  0x10   :  { %v139_v5 = vld [vmem:[#allocation7 + $0x78] sm:$0xff]  ;;  %v138_v6 = vld [vmem:[#allocation7 + $0x70] sm:$0xff]  ;;  %v137_v8 = vld [vmem:[#allocation7 + $0x68] sm:$0xff] }
  0x11   :  { %100 = vmatpush.msra.mxu0 %v93_v1  ;;  %250 = vmatpush.msra.mxu2 %v93_v1  ;;  %v89_v7 = vld [vmem:[#allocation5 + $0x50] sm:$0xff]  ;;  %v88_v9 = vld [vmem:[#allocation5 + $0x48] sm:$0xff]  ;;  %v136_v10 = vld [vmem:[#allocation7 + $0x60] sm:$0xff] }
  0x12   :  { %144 = vmatpush.msra.mxu1 %v139_v5  ;;  %265 = vmatpush.msra.mxu3 %v139_v5  ;;  %v87_v11 = vld [vmem:[#allocation5 + $0x40] sm:$0xff]  ;;  %v135_v12 = vld [vmem:[#allocation7 + $0x58] sm:$0xff]  ;;  %v134_v14 = vld [vmem:[#allocation7 + $0x50] sm:$0xff] }
  0x13   :  { %101 = vmatpush.msra.mxu0 %v92_v2  ;;  %251 = vmatpush.msra.mxu2 %v92_v2  ;;  %v86_v13 = vld [vmem:[#allocation5 + $0x38] sm:$0xff]  ;;  %v85_v15 = vld [vmem:[#allocation5 + $0x30] sm:$0xff]  ;;  %v133_v16 = vld [vmem:[#allocation7 + $0x48] sm:$0xff] }
  0x14   :  { %145 = vmatpush.msra.mxu1 %v138_v6  ;;  %266 = vmatpush.msra.mxu3 %v138_v6  ;;  %v84_v17 = vld [vmem:[#allocation5 + $0x28] sm:$0xff]  ;;  %v132_v18 = vld [vmem:[#allocation7 + $0x40] sm:$0xff]  ;;  %v131_v20 = vld [vmem:[#allocation7 + $0x38] sm:$0xff] }
  0x15   :  { %102 = vmatpush.msra.mxu0 %v91_v3  ;;  %252 = vmatpush.msra.mxu2 %v91_v3  ;;  %v83_v19 = vld [vmem:[#allocation5 + $0x20] sm:$0xff]  ;;  %v82_v21 = vld [vmem:[#allocation5 + $0x18] sm:$0xff]  ;;  %v130_v22 = vld [vmem:[#allocation7 + $0x30] sm:$0xff] }
  0x16   :  { %146 = vmatpush.msra.mxu1 %v137_v8  ;;  %267 = vmatpush.msra.mxu3 %v137_v8  ;;  %v81_v23 = vld [vmem:[#allocation5 + $0x10] sm:$0xff]  ;;  %v129_v24 = vld [vmem:[#allocation7 + $0x28] sm:$0xff]  ;;  %v128_v26 = vld [vmem:[#allocation7 + $0x20] sm:$0xff] }
  0x17   :  { %103 = vmatpush.msra.mxu0 %v90_v4  ;;  %253 = vmatpush.msra.mxu2 %v90_v4  ;;  %v80_v25 = vld [vmem:[#allocation5 + $0x8] sm:$0xff]  ;;  %v79_v27 = vld [vmem:[#allocation5] sm:$0xff]  ;;  %v77_v28 = vld [vmem:[#allocation2] sm:$0xff] }
  0x18   :  { %147 = vmatpush.msra.mxu1 %v136_v10  ;;  %268 = vmatpush.msra.mxu3 %v136_v10  ;;  %v78_v29 = vld [vmem:[#allocation2 + $0x8] sm:$0xff]  ;;  %v126_v31 = vld [vmem:[#allocation7 + $0x10] sm:$0xff]  ;;  %v125_v32 = vld [vmem:[#allocation7 + $0x8] sm:$0xff] }
  0x19   :  { %104 = vmatpush.msra.mxu0 %v89_v7  ;;  %254 = vmatpush.msra.mxu2 %v89_v7  ;;  %v127_v30 = vld [vmem:[#allocation7 + $0x18] sm:$0xff]  ;;  %v124_v33 = vld [vmem:[#allocation7] sm:$0xff]  ;;  %v287_v34 = vld [vmem:[%s490_s2] ss:$0 sm:$0xff] }
  0x1a   :  { %148 = vmatpush.msra.mxu1 %v135_v12  ;;  %269 = vmatpush.msra.mxu3 %v135_v12  ;;  %v288_v41 = vld [vmem:[%s492_s4] ss:$0 sm:$0xff] }
  0x1b   :  { %105 = vmatpush.msra.mxu0 %v88_v9  ;;  %255 = vmatpush.msra.mxu2 %v88_v9  ;;  %v289_v50 = vld [vmem:[%s495_s7] ss:$0 sm:$0xff] }
  0x1c   :  { %149 = vmatpush.msra.mxu1 %v134_v14  ;;  %270 = vmatpush.msra.mxu3 %v134_v14  ;;  %v290_v7 = vld [vmem:[%s493_s5] ss:$0 sm:$0xff]  ;;  %s403_s5 = smov [#allocation8]  }
  0x1d   :  { %106 = vmatpush.msra.mxu0 %v87_v11  ;;  %256 = vmatpush.msra.mxu2 %v87_v11  ;;  %v291_v11 = vld [vmem:[%s494_s6] ss:$0 sm:$0xff]  ;;  %s233_s26 = sshll.u32 %s403_s5, 4  ;;  %s234_s26 = int_to_ptr.vmem [resolvable:$true] %s233_s26 }
  0x1e   :  { %150 = vmatpush.msra.mxu1 %v133_v16  ;;  %271 = vmatpush.msra.mxu3 %v133_v16 }
  0x1f   :  { %107 = vmatpush.msra.mxu0 %v86_v13  ;;  %257 = vmatpush.msra.mxu2 %v86_v13 }
  0x20   :  { %151 = vmatpush.msra.mxu1 %v132_v18  ;;  %272 = vmatpush.msra.mxu3 %v132_v18 }
  0x21   :  { %108 = vmatpush.msra.mxu0 %v85_v15  ;;  %258 = vmatpush.msra.mxu2 %v85_v15 }
  0x22   :  { %152 = vmatpush.msra.mxu1 %v131_v20  ;;  %273 = vmatpush.msra.mxu3 %v131_v20 }
  0x23   :  { %109 = vmatpush.msra.mxu0 %v84_v17  ;;  %259 = vmatpush.msra.mxu2 %v84_v17 }
  0x24   :  { %153 = vmatpush.msra.mxu1 %v130_v22  ;;  %274 = vmatpush.msra.mxu3 %v130_v22 }
  0x25   :  { %110 = vmatpush.msra.mxu0 %v83_v19  ;;  %260 = vmatpush.msra.mxu2 %v83_v19 }
  0x26   :  { %154 = vmatpush.msra.mxu1 %v129_v24  ;;  %275 = vmatpush.msra.mxu3 %v129_v24 }
  0x27   :  { %111 = vmatpush.msra.mxu0 %v82_v21  ;;  %261 = vmatpush.msra.mxu2 %v82_v21 }
  0x28   :  { %155 = vmatpush.msra.mxu1 %v128_v26  ;;  %276 = vmatpush.msra.mxu3 %v128_v26 }
  0x29   :  { %112 = vmatpush.msra.mxu0 %v81_v23  ;;  %262 = vmatpush.msra.mxu2 %v81_v23 }
  0x2a   :  { %156 = vmatpush.msra.mxu1 %v127_v30  ;;  %277 = vmatpush.msra.mxu3 %v127_v30 }
  0x2b   :  { %113 = vmatpush.msra.mxu0 %v80_v25  ;;  %263 = vmatpush.msra.mxu2 %v80_v25 }
  0x2c   :  { %157 = vmatpush.msra.mxu1 %v126_v31  ;;  %278 = vmatpush.msra.mxu3 %v126_v31 }
  0x2d   :  { %114 = vmatpush.msra.mxu0 %v79_v27  ;;  %264 = vmatpush.msra.mxu2 %v79_v27 }
  0x2e   :  { %115 = vmatmul.f32.vlgmr.msra.gmra.mxu0 %v77_v28  ;;  %118 = vmatmul.f32.vlgmr.msra.gmra.mxu2 %v78_v29 }
  0x2f   :  { %158 = vmatpush.msra.mxu1 %v125_v32  ;;  %279 = vmatpush.msra.mxu3 %v125_v32 }
  0x31   :  { %159 = vmatpush.msra.mxu1 %v124_v33  ;;  %280 = vmatpush.msra.mxu3 %v124_v33 }
  0xab   :  { %v116_v35 = vpop.f32.mrf.mxu0 }
  0xac   :  { %v117_v36 = vadd.f32 %v287_v34, %v116_v35 }
  0xae   :  { %v122_v37 = vmax.f32 %v117_v36, 0.0 }
  0xb0   :  { %160 = vmatmul.f32.vlgmr.msra.gmra.mxu1 %v122_v37 }
  0xb1   :  { %v119_v38 = vpop.f32.mrf.mxu2 }
  0xb2   :  { %v120_v39 = vadd.f32 %v287_v34, %v119_v38 }
  0xb4   :  { %v123_v40 = vmax.f32 %v120_v39, 0.0 }
  0xb6   :  { %163 = vmatmul.f32.vlgmr.msra.gmra.mxu3 %v123_v40 }
 0x12d   :  { %v161_v42 = vpop.f32.mrf.mxu1 }
 0x12e   :  { %v162_v43 = vadd.f32 %v288_v41, %v161_v42 }
 0x130   :  { %v167_v44 = vadd.f32 %v162_v43, %v77_v28 }
 0x132   :  { %169 = vadd.xlane.f32.xlu0 %v167_v44 }
 0x139   :  { %v164_v45 = vpop.f32.mrf.mxu3 }
 0x13a   :  { %v165_v46 = vadd.f32 %v288_v41, %v164_v45 }
 0x13c   :  { %v168_v47 = vadd.f32 %v165_v46, %v78_v29 }
 0x13e   :  { %171 = vadd.xlane.f32.xlu0 %v168_v47 }
 0x1a5   :  { %v170_v48 = vpop.xlane.xlu0 %169 }
 0x1a6   :  { %v173_v49 = vmul.f32 0.03125, %v170_v48 }
 0x1a8   :  { %v175_v51 = vsub.f32 %v167_v44, %v173_v49 }
 0x1aa   :  { %v181_v52 = vmul.f32 %v289_v50, %v175_v51 }
 0x1ac   :  { %v183_v53 = vmul.f32 %v181_v52, %v181_v52 }
 0x1ae   :  { %185 = vadd.xlane.f32.xlu1 %v183_v53 }
 0x1b1   :  { %v172_v54 = vpop.xlane.xlu0 %171 }
 0x1b2   :  { %v174_v55 = vmul.f32 0.03125, %v172_v54 }
 0x1b4   :  { %v176_v56 = vsub.f32 %v168_v47, %v174_v55 }
 0x1b6   :  { %v182_v57 = vmul.f32 %v289_v50, %v176_v56 }
 0x1b8   :  { %v184_v58 = vmul.f32 %v182_v57, %v182_v57 }
 0x1ba   :  { %187 = vadd.xlane.f32.xlu1 %v184_v58 }
 0x221   :  { %v186_v59 = vpop.xlane.xlu1 %185 }
 0x222   :  { %v189_v60 = vmul.f32 0.03125, %v186_v59 }
 0x224   :  { %v191_v61 = vadd.f32 1e-06, %v189_v60 }
 0x226   :  { %292 = vrsqrt.f32 %v191_v61  ;;  %vm199_vm1 = vweird.f32 %v191_v61 }
 0x22c   :  { %v293_v62 = vpop.eup %292 }
 0x22d   :  { %v194_v63 = vmul.f32 %v293_v62, %v191_v61  ;;  %v188_v0 = vpop.xlane.xlu1 %187  ;;  %vm200_vm0 = vweird.f32 %v293_v62 }
 0x22e   :  { %v190_v1 = vmul.f32 0.03125, %v188_v0  ;;  %vm201_vm2 = vmor %vm199_vm1, %vm200_vm0 }
 0x22f   :  { %v195_v2 = vmul.f32 %v293_v62, %v194_v63 }
 0x230   :  { %v192_v3 = vadd.f32 1e-06, %v190_v1 }
 0x231   :  { %v196_v4 = vmul.f32 0.5, %v195_v2 }
 0x232   :  { %294 = vrsqrt.f32 %v192_v3  ;;  %vm209_vm4 = vweird.f32 %v192_v3 }
 0x233   :  { %v197_v5 = vsub.f32 1.5, %v196_v4 }
 0x235   :  { %v198_v6 = vmul.f32 %v293_v62, %v197_v5 }
 0x237   :  { %v202_v8 = vsel %vm201_vm2, %v293_v62, %v198_v6 }
 0x238   :  { %v295_v9 = vpop.eup %294  ;;  %v213_v10 = vmul.f32 %v202_v8, %v175_v51 }
 0x239   :  { %v204_v12 = vmul.f32 %v295_v9, %v192_v3  ;;  %vm210_vm3 = vweird.f32 %v295_v9 }
 0x23a   :  { %v219_v13 = vmul.f32 %v290_v7, %v213_v10  ;;  %vm211_vm5 = vmor %vm209_vm4, %vm210_vm3 }
 0x23b   :  { %v205_v14 = vmul.f32 %v295_v9, %v204_v12 }
 0x23c   :  { %v225_v15 = vadd.f32 %v291_v11, %v219_v13 }
 0x23d   :  { %v206_v16 = vmul.f32 0.5, %v205_v14 }
 0x23e   :  { %227 = vst [vmem:[#allocation8] sm:$0xff] %v225_v15 }
 0x23f   :  { %v207_v17 = vsub.f32 1.5, %v206_v16 }
 0x241   :  { %v208_v18 = vmul.f32 %v295_v9, %v207_v17 }
 0x243   :  { %v212_v19 = vsel %vm211_vm5, %v295_v9, %v208_v18 }
 0x244   :  { %v214_v20 = vmul.f32 %v212_v19, %v176_v56 }
 0x246   :  { %v220_v21 = vmul.f32 %v290_v7, %v214_v20 }
 0x248   :  { %v226_v22 = vadd.f32 %v291_v11, %v220_v21 }
 0x24a   :  { %228 = vst [vmem:[#allocation8 + $0x8] sm:$0xff] %v226_v22 }
 0x24b   :  { %241 = dma.vmem_to_hbm [thread:$0]  %s234_s26, 256, %s236_s29, [#allocation4], %s399_s13, %s399_s13, %s400_s14  }
 0x24c   :  { %396 = dma.done.wait [#allocation4], 256  }
 0x24d   :  { %397 = vsyncadd [#allocation4], 4294967040 }
 0x24e   :  { %246 = vsyncpa [#allocation3], 1 }
 0x24f   :  { %247 = vsyncpa [#allocation6], 1 }
 0x250   :  { %248 = vsyncpa [#allocation4], 1 }

</bundles_post_ra>
